<compile_context>
chip_gen: v7x
topology: tpu7x:2x2x1
jax: 0.10.0
libtpu: 0.0.40
codegen_flags: <defaults>
</compile_context>

<pallas_src>
import jax
import jax.numpy as jnp
from jax import lax
from jax.experimental import pallas as pl
from jax.experimental.pallas import tpu as pltpu


def _cdiv(a, b):
    return (a + b - 1) // b


def _round_up(x, m):
    return ((x + m - 1) // m) * m


def value_net_kernel(x_ref, w1t_ref, b1_ref, w2t_ref, b2_ref, w3t_ref, b3_ref, o_ref):
    # x tile: (TILE_B, S) in its natural layout; cast to bf16 in-kernel (free VPU work)
    # so the MXU sees bf16 operands while x stays f32 in HBM (single HBM pass).
    xb = x_ref[...].astype(jnp.bfloat16)

    # fc1 + ReLU: (H, S) x (TILE_B, S) contracted on S (NT matmul) -> (H, TILE_B),
    # batch lane-dense, f32 accumulation on the MXU.
    h = lax.dot_general(w1t_ref[...], xb, (((1,), (1,)), ((), ())),
                        preferred_element_type=jnp.float32)
    h = jnp.maximum(h + b1_ref[...], 0.0)

    # fc2 + ReLU: (H, H) @ (H, TILE_B) -> (H, TILE_B), bf16 operands, f32 accumulate.
    h = jnp.dot(w2t_ref[...], h.astype(jnp.bfloat16),
                preferred_element_type=jnp.float32)
    h = jnp.maximum(h + b2_ref[...], 0.0)

    # fc3 (out_features=1): VPU multiply + sublane (XLU) reduce over H, producing a
    # lane-dense (1, TILE_B) output row; all in f32.
    o_ref[...] = jnp.sum(w3t_ref[...] * h, axis=0, keepdims=True) + b3_ref[...]


def _choose_tiling(B, tile_b):
    # Defensive: tile must be a multiple of 128 lanes ((8,128) rule on the output row).
    tile_b = max(128, _round_up(int(tile_b), 128))
    # v7x has 2 TensorCores: ensure >= 2 grid steps whenever B allows (no-op on 1-TC chips).
    tile_b = min(tile_b, max(128, _round_up(_cdiv(B, 2), 128)))
    # Balance tiles so the last one is not mostly padding.
    num_tiles = _cdiv(B, tile_b)
    tile_b = _round_up(_cdiv(B, num_tiles), 128)
    b_pad = num_tiles * tile_b
    return tile_b, num_tiles, b_pad


def value_network(x, params, tile_b=8192):
    """x: (B, state_size) float32. Returns (B, 1) float32."""
    w1, b1, w2, b2, w3, b3 = params          # w*: (in, out), b*: (out,)
    B, S = x.shape
    H = w1.shape[1]

    tile_b, num_tiles, b_pad = _choose_tiling(B, tile_b)

    x = x.astype(jnp.float32)
    if b_pad != B:
        # Zero-pad extra batch rows only when B doesn't exactly fill the grid.
        # No transpose / relayout: x keeps its natural (batch, feature) layout.
        x = jnp.zeros((b_pad, S), jnp.float32).at[:B, :].set(x)

    # Weights pre-transposed for the (features, batch) activation layout.
    # Matmul operands in bf16 (MXU feed); biases / fc3 vector stay f32 (VPU/XLU math).
    w1t = w1.T.astype(jnp.bfloat16)                 # (H, S)
    w2t = w2.T.astype(jnp.bfloat16)                 # (H, H)
    w3t = w3.reshape(H, 1).astype(jnp.float32)      # (H, 1)
    b1c = b1.reshape(H, 1).astype(jnp.float32)
    b2c = b2.reshape(H, 1).astype(jnp.float32)
    b3c = b3.reshape(1, 1).astype(jnp.float32)

    # Weights/biases: full-array blocks with a constant index_map -> VMEM-resident
    # across all grid steps (DMA'd once, never re-fetched).
    def resident(a):
        return pl.BlockSpec(a.shape, lambda i, _nd=a.ndim: (0,) * _nd)

    out_t = pl.pallas_call(
        value_net_kernel,
        out_shape=jax.ShapeDtypeStruct((1, b_pad), jnp.float32),
        grid=(num_tiles,),
        in_specs=[
            pl.BlockSpec((tile_b, S), lambda i: (i, 0)),     # x tile, natural layout
            resident(w1t), resident(b1c),
            resident(w2t), resident(b2c),
            resident(w3t), resident(b3c),
        ],
        out_specs=pl.BlockSpec((1, tile_b), lambda i: (0, i)),  # lane-dense output row
        compiler_params=pltpu.CompilerParams(
            dimension_semantics=("parallel",),
        ),
    )(x, w1t, b1c, w2t, b2c, w3t, b3c)

    # (1, B_pad) -> (B, 1)
    return out_t[0, :B].reshape(B, 1)


def init_params(key, state_size, hidden_size):
    """Deterministic init mirroring nn.Linear default: U(-1/sqrt(fan_in), 1/sqrt(fan_in))."""
    ks = jax.random.split(key, 6)

    def linear(kw, kb, fan_in, fan_out):
        bound = 1.0 / jnp.sqrt(jnp.float32(fan_in))
        w = jax.random.uniform(kw, (fan_in, fan_out), jnp.float32, -bound, bound)
        b = jax.random.uniform(kb, (fan_out,), jnp.float32, -bound, bound)
        return w, b

    w1, b1 = linear(ks[0], ks[1], state_size, hidden_size)
    w2, b2 = linear(ks[2], ks[3], hidden_size, hidden_size)
    w3, b3 = linear(ks[4], ks[5], hidden_size, 1)
    return (w1, b1, w2, b2, w3, b3)


def value_network_ref(x, params):
    w1, b1, w2, b2, w3, b3 = params
    h = jnp.maximum(x @ w1 + b1, 0.0)
    h = jnp.maximum(h @ w2 + b2, 0.0)
    return h @ w3 + b3


if __name__ == "__main__":
    batch, state_size, hidden_size = 8, 16, 32
    key = jax.random.PRNGKey(0)
    k_x, k_p = jax.random.split(key)

    x = jax.random.normal(k_x, (batch, state_size), jnp.float32)
    params = init_params(k_p, state_size, hidden_size)

    out = value_network(x, params)
    out = jax.block_until_ready(out)

    ref = value_network_ref(x, params)
    assert out.shape == (batch, 1)
    # bf16 MXU operands change rounding vs. the f32 reference -> looser tolerance.
    assert jnp.allclose(out, ref, atol=2e-2, rtol=2e-2)
    print("KERNEL_OK")
</pallas_src>

<mosaic_0001>
module attributes {stable_mosaic.version = 11 : i64} {
  func.func @value_net_kernel(%arg0: i32, %arg1: memref<128x16xf32, #tpu.memory_space<vmem>>, %arg2: memref<32x16xbf16, #tpu.memory_space<vmem>>, %arg3: memref<32x1xf32, #tpu.memory_space<vmem>>, %arg4: memref<32x32xbf16, #tpu.memory_space<vmem>>, %arg5: memref<32x1xf32, #tpu.memory_space<vmem>>, %arg6: memref<32x1xf32, #tpu.memory_space<vmem>>, %arg7: memref<1x1xf32, #tpu.memory_space<vmem>>, %arg8: memref<1x128xf32, #tpu.memory_space<vmem>>) attributes {dimension_semantics = [#tpu.dimension_semantics<parallel>], iteration_bounds = array<i64: 1>, scalar_prefetch = 0 : i64, scratch_operands = 0 : i64, tpu.core_type = #tpu.core_type<tc>, window_params = [{transform_indices = @transform_0, window_bounds = array<i64: 128, 16>}, {pipeline_mode = #tpu.pipeline_mode<synchronous>, transform_indices = @transform_1, window_bounds = array<i64: 32, 16>}, {pipeline_mode = #tpu.pipeline_mode<synchronous>, transform_indices = @transform_2, window_bounds = array<i64: 32, 1>}, {pipeline_mode = #tpu.pipeline_mode<synchronous>, transform_indices = @transform_3, window_bounds = array<i64: 32, 32>}, {pipeline_mode = #tpu.pipeline_mode<synchronous>, transform_indices = @transform_4, window_bounds = array<i64: 32, 1>}, {pipeline_mode = #tpu.pipeline_mode<synchronous>, transform_indices = @transform_5, window_bounds = array<i64: 32, 1>}, {pipeline_mode = #tpu.pipeline_mode<synchronous>, transform_indices = @transform_6, window_bounds = array<i64: 1, 1>}, {transform_indices = @transform_7, window_bounds = array<i64: 1, 128>}]} {
    %c0 = arith.constant 0 : index
    %c0_0 = arith.constant 0 : index
    %0 = vector.load %arg1[%c0, %c0_0] : memref<128x16xf32, #tpu.memory_space<vmem>>, vector<128x16xf32>
    %1 = arith.truncf %0 : vector<128x16xf32> to vector<128x16xbf16>
    %c0_1 = arith.constant 0 : index
    %c0_2 = arith.constant 0 : index
    %2 = vector.load %arg2[%c0_1, %c0_2] : memref<32x16xbf16, #tpu.memory_space<vmem>>, vector<32x16xbf16>
    %cst = arith.constant dense<0.000000e+00> : vector<32x128xf32>
    %3 = tpu.matmul %2, %1, %cst {dimension_numbers = #tpu.dot_dimension_numbers<[1], [1], [0], [0], [0, 0, 1, 0], [], []>} : vector<32x16xbf16>, vector<128x16xbf16>, vector<32x128xf32> -> vector<32x128xf32>
    %c0_3 = arith.constant 0 : index
    %c0_4 = arith.constant 0 : index
    %4 = vector.load %arg3[%c0_3, %c0_4] : memref<32x1xf32, #tpu.memory_space<vmem>>, vector<32x1xf32>
    %5 = vector.broadcast %4 : vector<32x1xf32> to vector<32x128xf32>
    %6 = arith.addf %3, %5 : vector<32x128xf32>
    %cst_5 = arith.constant 0.000000e+00 : f32
    %7 = vector.broadcast %cst_5 : f32 to vector<32x128xf32>
    %8 = arith.maximumf %6, %7 : vector<32x128xf32>
    %c0_6 = arith.constant 0 : index
    %c0_7 = arith.constant 0 : index
    %9 = vector.load %arg4[%c0_6, %c0_7] : memref<32x32xbf16, #tpu.memory_space<vmem>>, vector<32x32xbf16>
    %10 = arith.truncf %8 : vector<32x128xf32> to vector<32x128xbf16>
    %cst_8 = arith.constant dense<0.000000e+00> : vector<32x128xf32>
    %11 = tpu.matmul %9, %10, %cst_8 {dimension_numbers = #tpu.dot_dimension_numbers<[1], [0], [0], [1], [0, 0, 1, 1], [], []>} : vector<32x32xbf16>, vector<32x128xbf16>, vector<32x128xf32> -> vector<32x128xf32>
    %c0_9 = arith.constant 0 : index
    %c0_10 = arith.constant 0 : index
    %12 = vector.load %arg5[%c0_9, %c0_10] : memref<32x1xf32, #tpu.memory_space<vmem>>, vector<32x1xf32>
    %13 = vector.broadcast %12 : vector<32x1xf32> to vector<32x128xf32>
    %14 = arith.addf %11, %13 : vector<32x128xf32>
    %cst_11 = arith.constant 0.000000e+00 : f32
    %15 = vector.broadcast %cst_11 : f32 to vector<32x128xf32>
    %16 = arith.maximumf %14, %15 : vector<32x128xf32>
    %c0_12 = arith.constant 0 : index
    %c0_13 = arith.constant 0 : index
    %17 = vector.load %arg6[%c0_12, %c0_13] : memref<32x1xf32, #tpu.memory_space<vmem>>, vector<32x1xf32>
    %18 = vector.broadcast %17 : vector<32x1xf32> to vector<32x128xf32>
    %19 = arith.mulf %18, %16 : vector<32x128xf32>
    %cst_14 = arith.constant dense<0.000000e+00> : vector<128xf32>
    %20 = vector.multi_reduction <add>, %19, %cst_14 [0] : vector<32x128xf32> to vector<128xf32>
    %21 = vector.shape_cast %20 : vector<128xf32> to vector<1x128xf32>
    %c0_15 = arith.constant 0 : index
    %c0_16 = arith.constant 0 : index
    %22 = vector.load %arg7[%c0_15, %c0_16] : memref<1x1xf32, #tpu.memory_space<vmem>>, vector<1x1xf32>
    %23 = vector.broadcast %22 : vector<1x1xf32> to vector<1x128xf32>
    %24 = arith.addf %21, %23 : vector<1x128xf32>
    %c0_17 = arith.constant 0 : index
    %c0_18 = arith.constant 0 : index
    %25 = vector.load %arg8[%c0_17, %c0_18] : memref<1x128xf32, #tpu.memory_space<vmem>>, vector<1x128xf32>
    tpu.vector_store %arg8[%c0_17, %c0_18], %24 {strides = array<i32>} : memref<1x128xf32, #tpu.memory_space<vmem>>, vector<1x128xf32>,
    return
  }
  func.func @transform_0(%arg0: i32) -> (i32, i32) {
    %c0_i32 = arith.constant 0 : i32
    %c0_i32_0 = arith.constant 0 : i32
    return %arg0, %c0_i32 : i32, i32
  }
  func.func @transform_1(%arg0: i32) -> (i32, i32) {
    %c0_i32 = arith.constant 0 : i32
    %c0_i32_0 = arith.constant 0 : i32
    %c0_i32_1 = arith.constant 0 : i32
    return %c0_i32, %c0_i32_0 : i32, i32
  }
  func.func @transform_2(%arg0: i32) -> (i32, i32) {
    %c0_i32 = arith.constant 0 : i32
    %c0_i32_0 = arith.constant 0 : i32
    %c0_i32_1 = arith.constant 0 : i32
    return %c0_i32, %c0_i32_0 : i32, i32
  }
  func.func @transform_3(%arg0: i32) -> (i32, i32) {
    %c0_i32 = arith.constant 0 : i32
    %c0_i32_0 = arith.constant 0 : i32
    %c0_i32_1 = arith.constant 0 : i32
    return %c0_i32, %c0_i32_0 : i32, i32
  }
  func.func @transform_4(%arg0: i32) -> (i32, i32) {
    %c0_i32 = arith.constant 0 : i32
    %c0_i32_0 = arith.constant 0 : i32
    %c0_i32_1 = arith.constant 0 : i32
    return %c0_i32, %c0_i32_0 : i32, i32
  }
  func.func @transform_5(%arg0: i32) -> (i32, i32) {
    %c0_i32 = arith.constant 0 : i32
    %c0_i32_0 = arith.constant 0 : i32
    %c0_i32_1 = arith.constant 0 : i32
    return %c0_i32, %c0_i32_0 : i32, i32
  }
  func.func @transform_6(%arg0: i32) -> (i32, i32) {
    %c0_i32 = arith.constant 0 : i32
    %c0_i32_0 = arith.constant 0 : i32
    %c0_i32_1 = arith.constant 0 : i32
    return %c0_i32, %c0_i32_0 : i32, i32
  }
  func.func @transform_7(%arg0: i32) -> (i32, i32) {
    %c0_i32 = arith.constant 0 : i32
    %c0_i32_0 = arith.constant 0 : i32
    return %c0_i32, %arg0 : i32, i32
  }
}

</mosaic_0001>

<bundles_post_ra>
// kernel: tpu_custom_call.1
= control target key start
LH: loop header
LB: loop body
LE: loop exit
PB: predicated region body
PF: predicated region fallthrough
CT: control target
= control target key end

     0   :  { %s602_s0 = inlined_call_operand.vmem [shape: f32[128,16], index: 0, kind: input, shape index: {}]   ;;  %s603_s1 = inlined_call_operand.vmem [shape: bf16[32,16], index: 1, kind: input, shape index: {}]   ;;  %s604_s2 = inlined_call_operand.vmem [shape: f32[32,1], index: 2, kind: input, shape index: {}]   ;;  %s605_s3 = inlined_call_operand.vmem [shape: bf16[32,32], index: 3, kind: input, shape index: {}]   ;;  %s606_s4 = inlined_call_operand.vmem [shape: f32[32,1], index: 4, kind: input, shape index: {}]   ;;  %s607_s5 = inlined_call_operand.vmem [shape: f32[32,1], index: 5, kind: input, shape index: {}]   ;;  %s608_s6 = inlined_call_operand.<no memory space> [shape: f32[1,1], index: 6, kind: input, shape index: {}]   ;;  %s609_s7 = inlined_call_operand.hbm [shape: f32[1,128], index: 7, kind: output, shape index: {}]  }
   0x1   :  { %v12_v0 = vstv %s608_s6 }
   0x2   :  { %13 = vst [vmem:[#allocation2] sm:$0x1] %v12_v0 }
   0x3   :  { %v30_v1 = vld [vmem:[%s602_s0] sm:$0xff]  ;;  %v31_v2 = vld [vmem:[%s602_s0 + $0x8] sm:$0xff]  ;;  %vm92_vm0 = vcmask 130048   ;;  %v32_v3 = vld [vmem:[%s602_s0 + $0x10] sm:$0xff]  ;;  %v429_v6 = vmov 0  }
   0x4   :  { %v46_v4 = vpack.c.bf16 %v31_v2, %v30_v1  ;;  %v33_v5 = vld [vmem:[%s602_s0 + $0x18] sm:$0xff]  ;;  %399 = vset.pattern.permute.xlu0 %v429_v6  ;;  %400 = vset.pattern.permute.xlu1 %v429_v6  ;;  %v34_v9 = vld [vmem:[%s602_s0 + $0x20] sm:$0xff]  ;;  %v35_v10 = vld [vmem:[%s602_s0 + $0x28] sm:$0xff] }
   0x5   :  { %v47_v7 = vpack.c.bf16 %v33_v5, %v32_v3  ;;  %v401_v11 = vld [vmem:[%s603_s1] sm:$0xff]   ;;  %v60_v13 = vld [vmem:[%s604_s2 + $0x10] sm:$0xff]  ;;  %v48_v15 = vpack.c.bf16 %v35_v10, %v34_v9  ;;  %v59_v16 = vld [vmem:[%s604_s2 + $0x8] sm:$0xff] }
   0x6   :  { %389 = vmatprep.subr.msk.bf16.mxu0 %vm92_vm0, %v46_v4  ;;  %v100_v8 = vsel %vm92_vm0, %v46_v4, 0  ;;  %v58_v12 = vld [vmem:[%s604_s2] sm:$0xff]  ;;  %377 = vmatprep.mubr.msk.bf16.mxu0 %vm92_vm0, %v401_v11  ;;  %v61_v17 = vld [vmem:[%s604_s2 + $0x18] sm:$0xff] }
   0x7   :  { %362 = vmatpush3.bf16.xpose.msra.mxu0 %v100_v8  ;;  %64 = vperm.xlu0 %399, %v58_v12   ;;  %v103_v14 = vsel %vm92_vm0, %v47_v7, 0  ;;  %v182_v18 = vld [vmem:[%s606_s4] sm:$0xff] }
   0x8   :  { %390 = vmatprep.subr.msk.bf16.mxu0 %vm92_vm0, %v47_v7  ;;  %74 = vperm.xlu1 %400, %v60_v13  }
   0xb   :  { %69 = vperm.xlu0 %399, %v59_v16  }
   0xc   :  { %79 = vperm.xlu1 %400, %v61_v17  }
   0xf   :  { %364 = vmatpush3.bf16.xpose.msra.mxu0 %v103_v14 }
  0x10   :  { %391 = vmatprep.subr.msk.bf16.mxu0 %vm92_vm0, %v48_v15 }
  0x11   :  { %14 = vsyncpa [#allocation4], 0  ;;  %v36_v19 = vld [vmem:[%s602_s0 + $0x30] sm:$0xff]  ;;  %v37_v20 = vld [vmem:[%s602_s0 + $0x38] sm:$0xff]  ;;  %188 = vperm.xlu0 %399, %v182_v18   ;;  %v106_v22 = vsel %vm92_vm0, %v48_v15, 0  ;;  %vm216_vm1 = vcmask 261120  }
  0x12   :  { %v183_v21 = vld [vmem:[%s606_s4 + $0x8] sm:$0xff]  ;;  %v49_v23 = vpack.c.bf16 %v37_v20, %v36_v19  ;;  %v184_v24 = vld [vmem:[%s606_s4 + $0x10] sm:$0xff]  ;;  %v185_v25 = vld [vmem:[%s606_s4 + $0x18] sm:$0xff] }
  0x13   :  { %193 = vperm.xlu1 %400, %v183_v21   ;;  %v276_v26 = vld [vmem:[%s607_s5] sm:$0xff]  ;;  %v39_v28 = vld [vmem:[%s602_s0 + $0x48] sm:$0xff]  ;;  %v278_v32 = vld [vmem:[%s607_s5 + $0x10] sm:$0xff] }
  0x14   :  { %v38_v27 = vld [vmem:[%s602_s0 + $0x40] sm:$0xff]  ;;  %v277_v29 = vld [vmem:[%s607_s5 + $0x8] sm:$0xff]  ;;  %v109_v30 = vsel %vm92_vm0, %v49_v23, 0  ;;  %v279_v33 = vld [vmem:[%s607_s5 + $0x18] sm:$0xff] }
  0x15   :  { %198 = vperm.xlu0 %399, %v184_v24   ;;  %v50_v31 = vpack.c.bf16 %v39_v28, %v38_v27  ;;  %v313_v34 = vld [vmem:[#allocation2] sm:$0x1]  ;;  %v40_v35 = vld [vmem:[%s602_s0 + $0x50] sm:$0xff]  ;;  %v41_v36 = vld [vmem:[%s602_s0 + $0x58] sm:$0xff] }
  0x16   :  { %v51_v38 = vpack.c.bf16 %v41_v36, %v40_v35  ;;  %v42_v39 = vld [vmem:[%s602_s0 + $0x60] sm:$0xff]  ;;  %v43_v40 = vld [vmem:[%s602_s0 + $0x68] sm:$0xff]  ;;  %v44_v43 = vld [vmem:[%s602_s0 + $0x70] sm:$0xff] }
  0x17   :  { %366 = vmatpush3.bf16.xpose.msra.mxu0 %v106_v22  ;;  %203 = vperm.xlu1 %400, %v185_v25   ;;  %v112_v37 = vsel %vm92_vm0, %v50_v31, 0  ;;  %v52_v42 = vpack.c.bf16 %v43_v40, %v42_v39  ;;  %v45_v44 = vld [vmem:[%s602_s0 + $0x78] sm:$0xff]  ;;  %v402_v48 = vld [vmem:[%s603_s1 + $0x8] sm:$0xff]   ;;  %v403_v49 = vld [vmem:[%s605_s3] sm:$0xff]  }
  0x18   :  { %392 = vmatprep.subr.msk.bf16.mxu0 %vm92_vm0, %v49_v23  ;;  %v115_v41 = vsel %vm92_vm0, %v51_v38, 0  ;;  %v53_v46 = vpack.c.bf16 %v45_v44, %v44_v43  ;;  %385 = vmatprep.mubr.msk.bf16.mxu1 %vm216_vm1, %v403_v49  ;;  %v404_v4 = vld [vmem:[%s605_s3 + $0x8] sm:$0xff]   ;;  %s430_s3 = smov [#allocation3]  }
  0x19   :  { %282 = vperm.xlu0 %399, %v276_v26   ;;  %v118_v45 = vsel %vm92_vm0, %v52_v42, 0  ;;  %s331_s12 = sshll.u32 %s430_s3, 4  ;;  %s332_s12 = int_to_ptr.vmem [resolvable:$true] %s331_s12 }
  0x1a   :  { %v121_v47 = vsel %vm92_vm0, %v53_v46, 0  ;;  %s405_s13 = scalar_lea.vmem %s332_s12, 16  ;;  %s409_s14 = scalar_lea.vmem %s332_s12, 32 }
  0x1b   :  { %287 = vperm.xlu1 %400, %v277_v29   ;;  %p406_p0 = scmp.ne.s32.totalorder %s332_s12, %s405_s13  ;;  %p410_p1 = scmp.lt.s32.totalorder %s332_s12, %s332_s12 }
  0x1c   :  { %p411_p2 = scmp.lt.s32.totalorder %s409_s14, %s405_s13 }
  0x1d   :  { %292 = vperm.xlu0 %399, %v278_v32  }
  0x1e   :  { %p412_p3 = por %p411_p2, %p410_p1 }
  0x1f   :  { %368 = vmatpush3.bf16.xpose.msra.mxu0 %v109_v30  ;;  %297 = vperm.xlu1 %400, %v279_v33  }
  0x20   :  { %393 = vmatprep.subr.msk.bf16.mxu0 %vm92_vm0, %v50_v31  ;;  %v319_v31 = vlaneseq  ;;  %p413_p4 = pnand %p412_p3, %p406_p0 }
  0x21   :  { %316 = vperm.xlu0 %399, %v313_v34  }
  0x22   :  { %v320_v34 = vshrl.u32 %v319_v31, 7 }
  0x27   :  { %370 = vmatpush3.bf16.xpose.msra.mxu0 %v112_v37  ;;  %v321_v37 = vsub.s32 0, %v320_v34 }
  0x28   :  { %394 = vmatprep.subr.msk.bf16.mxu0 %vm92_vm0, %v51_v38 }
  0x2f   :  { %372 = vmatpush3.bf16.xpose.msra.mxu0 %v115_v41 }
  0x30   :  { %395 = vmatprep.subr.msk.bf16.mxu0 %vm92_vm0, %v52_v42 }
  0x37   :  { %374 = vmatpush3.bf16.xpose.msra.mxu0 %v118_v45 }
  0x38   :  { %396 = vmatprep.subr.msk.bf16.mxu0 %vm92_vm0, %v53_v46 }
  0x3f   :  { %376 = vmatpush3.bf16.xpose.msra.mxu0 %v121_v47 }
  0x46   :  { %378 = vmatmul.mubr.msk.bf16.vlgmr.msra.gmra.mrb[0].mxu0 %vm92_vm0, %v402_v48 }
  0x86   :  { %v65_v51 = vpop.permute.xlu0 %64 }
  0x87   :  { %v75_v50 = vpop.permute.xlu1 %74 }
  0x8a   :  { %v70_v58 = vpop.permute.xlu0 %69 }
  0x8b   :  { %v80_v55 = vpop.permute.xlu1 %79 }
  0x90   :  { %v189_v5 = vpop.permute.xlu0 %188 }
  0x92   :  { %v194_v6 = vpop.permute.xlu1 %193 }
  0x94   :  { %v199_v7 = vpop.permute.xlu0 %198 }
  0x96   :  { %v204_v8 = vpop.permute.xlu1 %203 }
  0x98   :  { %v283_v14 = vpop.permute.xlu0 %282 }
  0x9a   :  { %v288_v19 = vpop.permute.xlu1 %287 }
  0x9c   :  { %v293_v25 = vpop.permute.xlu0 %292 }
  0x9e   :  { %v298_v28 = vpop.permute.xlu1 %297 }
  0xa0   :  { %v317_v39 = vpop.permute.xlu0 %316 }
  0xa1   :  { %v322_v41 = vrot.slane %v317_v39, %v321_v37 }
 0x119   :  { %v379_v52 = vpop.f32.mrb[0].mxu0 }
 0x11a   :  { %v166_v53 = vadd.f32 %v379_v52, %v75_v50  ;;  %v157_v54 = vpop.f32.mrb[1].mxu0 }
 0x11b   :  { %v158_v56 = vadd.f32 %v157_v54, %v65_v51  ;;  %v380_v57 = vpop.f32.mrb[2].mxu0 }
 0x11c   :  { %v169_v59 = vadd.f32 %v380_v57, %v80_v55  ;;  %v160_v60 = vpop.f32.mrb[3].mxu0  ;;  %v174_v62 = vmax.f32 %v166_v53, 0.0 }
 0x11d   :  { %v161_v61 = vadd.f32 %v160_v60, %v70_v58  ;;  %v172_v0 = vmax.f32 %v158_v56, 0.0 }
 0x11e   :  { %v175_v63 = vmax.f32 %v169_v59, 0.0 }
 0x11f   :  { %v173_v1 = vmax.f32 %v161_v61, 0.0 }
 0x120   :  { %v181_v2 = vpack.c.bf16 %v175_v63, %v174_v62 }
 0x121   :  { %v180_v3 = vpack.c.bf16 %v173_v1, %v172_v0 }
 0x123   :  { %381 = vmatprep.subr.bf16.mxu1 %v180_v3 }
 0x124   :  { %382 = vmatpush3.bf16.msra.mxu1 %v180_v3 }
 0x125   :  { %383 = vmatprep.subr.bf16.mxu1 %v181_v2 }
 0x128   :  { %384 = vmatpush3.bf16.msra.mxu1 %v181_v2 }
 0x12b   :  { %386 = vmatmul.mubr.msk.bf16.vlgmr.msra.gmra.mrb[0].mxu1 %vm216_vm1, %v404_v4 }
 0x1fe   :  { %v387_v9 = vpop.f32.mrb[0].mxu1 }
 0x1ff   :  { %v257_v10 = vpop.f32.mrb[1].mxu1  ;;  %v266_v11 = vadd.f32 %v387_v9, %v199_v7 }
 0x200   :  { %v258_v12 = vadd.f32 %v257_v10, %v189_v5  ;;  %v388_v13 = vpop.f32.mrb[2].mxu1 }
 0x201   :  { %v260_v15 = vpop.f32.mrb[3].mxu1  ;;  %v269_v17 = vadd.f32 %v388_v13, %v204_v8  ;;  %v274_v20 = vmax.f32 %v266_v11, 0.0 }
 0x202   :  { %v272_v16 = vmax.f32 %v258_v12, 0.0  ;;  %v261_v18 = vadd.f32 %v260_v15, %v194_v6 }
 0x203   :  { %v275_v23 = vmax.f32 %v269_v17, 0.0  ;;  %v302_v26 = vmul.f32 %v293_v25, %v274_v20 }
 0x204   :  { %v273_v21 = vmax.f32 %v261_v18, 0.0  ;;  %v300_v22 = vmul.f32 %v283_v14, %v272_v16 }
 0x205   :  { %v303_v29 = vmul.f32 %v298_v28, %v275_v23 }
 0x206   :  { %v301_v24 = vmul.f32 %v288_v19, %v273_v21 }
 0x208   :  { %v304_v27 = vadd.f32 %v301_v24, %v300_v22 }
 0x20a   :  { %v305_v30 = vadd.f32 %v304_v27, %v302_v26 }
 0x20c   :  { %v306_v32 = vadd.f32 %v305_v30, %v303_v29 }
 0x20e   :  { %v307_v33 = vrot.slane %v306_v32, 4 }
 0x210   :  { %v308_v35 = vadd.f32 %v307_v33, %v306_v32 }
 0x212   :  { %v309_v36 = vrot.slane %v308_v35, 2 }
 0x214   :  { %v310_v38 = vadd.f32 %v309_v36, %v308_v35 }
 0x216   :  { %v311_v40 = vrot.slane %v310_v38, 1 }
 0x218   :  { %v312_v42 = vadd.f32 %v311_v40, %v310_v38 }
 0x21a   :  { %v323_v43 = vadd.f32 %v322_v41, %v312_v42 }
 0x21c   :  { %324 = vst [vmem:[#allocation3] sm:$0x1] %v323_v43 }
 0x21d   :  { %416 = shalt.err (!%p413_p4)
}
 0x21e   :  { %s417_s17 = scalar_lea.hbm %s609_s7, 16 }
 0x21f   :  { %p418_p5 = scmp.ne.s32.totalorder %s609_s7, %s417_s17  ;;  %p421_p6 = scmp.lt.u32.totalorder %s417_s17, %s609_s7 }
 0x221   :  { %p423_p7 = pnand %p421_p6, %p418_p5 }
 0x223   :  { %426 = shalt.err (!%p423_p7)
}
 0x224   :  { %334 = dma.vmem_to_hbm [thread:$0]  %s332_s12, 16, %s609_s7, [#allocation4]  }
 0x225   :  { %427 = dma.done.wait [#allocation4], 16  }
 0x226   :  { %428 = vsyncadd [#allocation4], 4294967280 }
 0x227   :  { %338 = vsyncpa [#allocation4], 1 }

</bundles_post_ra>
